<compile_context>
chip_gen: v7x
topology: tpu7x:2x2x1
jax: 0.10.0
libtpu: 0.0.40
codegen_flags: <defaults>
</compile_context>

<pallas_src>
import jax
import jax.numpy as jnp
from jax.experimental import pallas as pl
from jax.experimental.pallas import tpu as pltpu


def _noise_injection_kernel(w_ref, img_ref, noise_ref, out_ref):
    # w_ref:    (1,) scalar parameter in SMEM.
    # img_ref:  (1, C, tile_hw) VMEM tile.
    # noise_ref:(1, 1, tile_hw) VMEM tile, broadcast over the channel axis.
    # out_ref:  (1, C, tile_hw) VMEM tile.
    w = w_ref[0]
    out_ref[...] = img_ref[...] + w * noise_ref[...]


def _pick_tile_hw(hw, c, itemsize):
    """Pick a lane-dense spatial tile.

    Returns a multiple of 128 that divides `hw` and keeps the (1, C, tile_hw)
    image tile at roughly <= 2 MiB; falls back to the full extent when hw is
    not a multiple of 128 (full-extent blocks are always legal).
    """
    if hw % 128 != 0:
        return hw
    target_bytes = 2 * 1024 * 1024
    target_elems = max(128, target_bytes // (max(c, 1) * max(itemsize, 1)))
    tile = min(hw, (target_elems // 128) * 128)
    tile = max(tile, 128)
    while hw % tile != 0:  # terminates: 128 divides hw, so tile=128 always works
        tile -= 128
    return tile


def noise_injection(image, weight, noise=None, *, key=None):
    """Pallas TPU implementation of NoiseInjection.forward.

    image:  (B, C, H, W)
    weight: (1,) scalar parameter
    noise:  optional (B, 1, H, W); sampled ~ N(0, 1) if None.
    """
    B, C, H, W = image.shape
    if noise is None:
        if key is None:
            key = jax.random.PRNGKey(0)
        # TODO(synk): noise could be generated in-kernel (pltpu.prng_seed +
        # pltpu.stateful_normal) to save one HBM round-trip of the noise
        # array, at the cost of a different RNG stream than jax.random.
        noise = jax.random.normal(key, (B, 1, H, W), dtype=image.dtype)

    hw = H * W
    tile_hw = _pick_tile_hw(hw, C, jnp.dtype(image.dtype).itemsize)
    n_hw = hw // tile_hw

    img2 = image.reshape(B, C, hw)
    noise2 = noise.reshape(B, 1, hw)
    weight = jnp.asarray(weight, dtype=image.dtype).reshape((1,))

    out = pl.pallas_call(
        _noise_injection_kernel,
        out_shape=jax.ShapeDtypeStruct((B, C, hw), image.dtype),
        grid_spec=pltpu.PrefetchScalarGridSpec(
            num_scalar_prefetch=0,
            grid=(B, n_hw),
            in_specs=[
                # scalar weight -> SMEM, whole (1,) array
                pl.BlockSpec(memory_space=pltpu.MemorySpace.SMEM),
                # image tile: all channels of one batch, one spatial slab
                pl.BlockSpec((1, C, tile_hw), lambda b, s: (b, 0, s)),
                # noise tile: single channel, same spatial slab (broadcast in-kernel)
                pl.BlockSpec((1, 1, tile_hw), lambda b, s: (b, 0, s)),
            ],
            out_specs=pl.BlockSpec((1, C, tile_hw), lambda b, s: (b, 0, s)),
        ),
        compiler_params=pltpu.CompilerParams(
            dimension_semantics=("parallel", "parallel"),
        ),
    )(weight, img2, noise2)

    return out.reshape(B, C, H, W)


if __name__ == "__main__":
    key = jax.random.PRNGKey(0)
    k_img, k_noise = jax.random.split(key, 2)

    B, C, H, W = 2, 4, 16, 16
    image = jax.random.normal(k_img, (B, C, H, W), dtype=jnp.float32)
    noise = jax.random.normal(k_noise, (B, 1, H, W), dtype=jnp.float32)

    # nn.Parameter(torch.zeros(1)) — module init. Also use a nonzero value to
    # actually exercise the broadcast-multiply path.
    weight_zero = jnp.zeros((1,), dtype=jnp.float32)
    weight_test = jnp.array([0.5], dtype=jnp.float32)

    # weight = 0 (module init): output == image.
    out0 = noise_injection(image, weight_zero, noise)
    jax.block_until_ready(out0)
    assert jnp.allclose(out0, image, atol=1e-6), "weight=0 path mismatch"

    # Nonzero weight vs reference formula (noise broadcasts over channels).
    out1 = noise_injection(image, weight_test, noise)
    jax.block_until_ready(out1)
    ref1 = image + weight_test[0] * noise
    assert jnp.allclose(out1, ref1, atol=1e-5, rtol=1e-5), "kernel mismatch"

    # noise=None branch (noise sampled in the wrapper with the given key).
    out2 = noise_injection(image, weight_test, noise=None, key=k_noise)
    jax.block_until_ready(out2)
    ref2 = image + weight_test[0] * jax.random.normal(
        k_noise, (B, 1, H, W), dtype=jnp.float32)
    assert jnp.allclose(out2, ref2, atol=1e-5, rtol=1e-5), "noise=None mismatch"

    print("KERNEL_OK")
</pallas_src>

<mosaic_0001>
module attributes {stable_mosaic.version = 11 : i64} {
  func.func @_noise_injection_kernel(%arg0: i32, %arg1: i32, %arg2: memref<1xf32, #tpu.memory_space<smem>>, %arg3: memref<1x4x256xf32, #tpu.memory_space<vmem>>, %arg4: memref<1x1x256xf32, #tpu.memory_space<vmem>>, %arg5: memref<1x4x256xf32, #tpu.memory_space<vmem>>) attributes {dimension_semantics = [#tpu.dimension_semantics<parallel>, #tpu.dimension_semantics<parallel>], iteration_bounds = array<i64: 2, 1>, scalar_prefetch = 0 : i64, scratch_operands = 0 : i64, tpu.core_type = #tpu.core_type<tc>, window_params = [{transform_indices = @transform_0, window_bounds = array<i64: 1>}, {transform_indices = @transform_1, window_bounds = array<i64: 1, 4, 256>}, {transform_indices = @transform_2, window_bounds = array<i64: 1, 1, 256>}, {transform_indices = @transform_3, window_bounds = array<i64: 1, 4, 256>}]} {
    %c0 = arith.constant 0 : index
    %0 = memref.load %arg2[%c0] : memref<1xf32, #tpu.memory_space<smem>>
    %c0_0 = arith.constant 0 : index
    %c0_1 = arith.constant 0 : index
    %c0_2 = arith.constant 0 : index
    %1 = vector.load %arg3[%c0_0, %c0_1, %c0_2] : memref<1x4x256xf32, #tpu.memory_space<vmem>>, vector<1x4x256xf32>
    %c0_3 = arith.constant 0 : index
    %c0_4 = arith.constant 0 : index
    %c0_5 = arith.constant 0 : index
    %2 = vector.load %arg4[%c0_3, %c0_4, %c0_5] : memref<1x1x256xf32, #tpu.memory_space<vmem>>, vector<1x1x256xf32>
    %3 = vector.broadcast %0 : f32 to vector<1x1x256xf32>
    %4 = arith.mulf %3, %2 : vector<1x1x256xf32>
    %5 = vector.broadcast %4 : vector<1x1x256xf32> to vector<1x4x256xf32>
    %6 = arith.addf %1, %5 : vector<1x4x256xf32>
    %c0_6 = arith.constant 0 : index
    %c0_7 = arith.constant 0 : index
    %c0_8 = arith.constant 0 : index
    %7 = vector.load %arg5[%c0_6, %c0_7, %c0_8] : memref<1x4x256xf32, #tpu.memory_space<vmem>>, vector<1x4x256xf32>
    tpu.vector_store %arg5[%c0_6, %c0_7, %c0_8], %6 {strides = array<i32>} : memref<1x4x256xf32, #tpu.memory_space<vmem>>, vector<1x4x256xf32>,
    return
  }
  func.func @transform_0(%arg0: i32, %arg1: i32) -> i32 {
    %c0_i32 = arith.constant 0 : i32
    %c0_i32_0 = arith.constant 0 : i32
    return %c0_i32 : i32
  }
  func.func @transform_1(%arg0: i32, %arg1: i32) -> (i32, i32, i32) {
    %c0_i32 = arith.constant 0 : i32
    %c0_i32_0 = arith.constant 0 : i32
    return %arg0, %c0_i32, %arg1 : i32, i32, i32
  }
  func.func @transform_2(%arg0: i32, %arg1: i32) -> (i32, i32, i32) {
    %c0_i32 = arith.constant 0 : i32
    %c0_i32_0 = arith.constant 0 : i32
    return %arg0, %c0_i32, %arg1 : i32, i32, i32
  }
  func.func @transform_3(%arg0: i32, %arg1: i32) -> (i32, i32, i32) {
    %c0_i32 = arith.constant 0 : i32
    %c0_i32_0 = arith.constant 0 : i32
    return %arg0, %c0_i32, %arg1 : i32, i32, i32
  }
}

</mosaic_0001>

<bundles_post_ra>
// kernel: tpu_custom_call.1
= control target key start
LH: loop header
LB: loop body
LE: loop exit
PB: predicated region body
PF: predicated region fallthrough
CT: control target
= control target key end

     0   :  { %s771_s0 = inlined_call_operand.<no memory space> [shape: f32[1], index: 0, kind: input, shape index: {}]   ;;  %s772_s1 = inlined_call_operand.hbm [shape: f32[2,4,256], index: 1, kind: input, shape index: {}]   ;;  %s773_s2 = inlined_call_operand.vmem [shape: f32[2,1,256], index: 2, kind: input, shape index: {}]   ;;  %s774_s3 = inlined_call_operand.hbm [shape: f32[2,4,256], index: 3, kind: output, shape index: {}]  }
   0x1   :  { %8 = sst [smem:[#allocation2]] %s771_s0 }
   0x2   :  { %9 = vsyncpa [#allocation4], 0 }
   0x3   :  { %11 = vsyncpa [#allocation4 + $0x1], 0 }
   0x4   :  { %12 = vsyncpa [#allocation5], 0 }
   0x5   :  { %14 = vsyncpa [#allocation5 + $0x1], 0  ;;  %s594_s14 = smov 0   ;;  %s596_s15 = smov 0  }
   0x6   :  { %s598_s16 = smov 0   ;;  %s600_s17 = smov 0  }
   0x7   :  { %s602_s18 = smov 0   ;;  %s604_s19 = smov 0  }
   0x8 LB: > { %s375_s0 = sadd.s32 4294967295, %s567_s19   ;;  %s376_s20 = sadd.s32 4294967294, %s567_s19   ;;  %s567_s19 = sphi %s604_s19, %s20_s19   ;;  %s563_s18 = sphi %s602_s18, %s790_s18   ;;  %s559_s17 = sphi %s600_s17, %s789_s17   ;;  %s555_s16 = sphi %s598_s16, %s788_s16   ;;  %s551_s15 = sphi %s596_s15, %s787_s15   ;;  %s547_s14 = sphi %s594_s14, %s786_s14  }
   0x9   : > { %s32_s21 = sadd.s32 1, %s563_s18  ;;  %s62_s22 = sadd.s32 1, %s555_s16 }
   0xa   : > { %p34_p0 = scmp.ge.s32.totalorder %s32_s21, 2  ;;  %p69_p1 = scmp.ne.s32.totalorder %s555_s16, %s551_s15 }
   0xb   : > { %p70_p2 = scmp.eq.s32.totalorder %s567_s19, 0  ;;  %p75_p3 = scmp.ne.s32.totalorder %s551_s15, %s547_s14 }
   0xc   : > { %s792_s21 = smov (%p34_p0, %s32_s21), 0  ;;  %p76_p5 = scmp.eq.s32.totalorder %s375_s0, 0 }
   0xd   : > { %p635_p4 = por %p70_p2, %p69_p1  ;;  %s57_s24 = ssub.s32 %s563_s18, %s792_s21 }
   0xe   : > { %p129_p6 = scmp.eq.s32.totalorder %s375_s0, 1  ;;  %p60_p7 = scmp.eq.s32.totalorder %s57_s24, 0 }
   0xf   : > { %p641_p8 = por %p76_p5, %p75_p3  ;;  %p135_p10 = scmp.eq.s32.totalorder %s376_s20, 1 }
  0x10   : > { %p645_p9 = por %p129_p6, %p69_p1  ;;  %p405_p13 = scmp.lt.s32.totalorder %s567_s19, 2 }
  0x11   : > { %s650_s27 = scalar_select %p60_p7, %s555_s16, %s62_s22  }
  0x12   : > { %s778_s26 = scalar_select %p645_p9, 1, 0 }
  0x13   : > { %p652_p11 = por %p135_p10, %p75_p3  ;;  %s158_s29 = sand.u32 1, %s555_s16  }
  0x14   : > { %s379_s30 = sshll.u32 %s158_s29, 3  ;;  %s391_s4 = sshll.u32 %s563_s18, 7 }
  0x15   : > { %s779_s28 = scalar_select %p652_p11, 1, 0 }
  0x16   : > { %s663_s7 = scalar_lea.hbm %s772_s1, %s391_s4  ;;  %s162_s8 = scalar_lea.vmem [#allocation3], %s379_s30 }
  0x17   : > { %s172_s9 = sshll.u32 %s162_s8, 4  ;;  %p669_p0 = pnand %p405_p13, %p635_p4  ;;  %s665_s9 = int_to_ptr.vmem [resolvable:$true] %s172_s9 }
  0x18   : > { %s159_s11 = scalar_lea.sflag [#allocation4], %s158_s29  ;;  %s455_s12 = scalar_lea.hbm %s663_s7, 128 }
  0x19   : > { %p456_p3 = scmp.ne.s32.totalorder %s663_s7, %s455_s12  ;;  %p457_p5 = pneg %p669_p0 }
  0x1a   : > { %s460_s20 = scalar_lea.hbm %s772_s1, 256  ;;  %p461_p4 = scmp.lt.u32.totalorder %s663_s7, %s772_s1 }
  0x1b   : > { %p458_p6 = pnand %p457_p5, %p456_p3  ;;  %p462_p10 = scmp.lt.u32.totalorder %s460_s20, %s455_s12 }
  0x1c   : > { %p464_p12 = scmp.lt.u32.totalorder %s455_s12, %s663_s7 }
  0x1d   : > { %p459_p7 = pneg %p458_p6  ;;  %p463_p13 = por %p462_p10, %p461_p4 }
  0x1f   : > { %p465_p1 = por %p464_p12, %p463_p13 }
  0x21   : > { %p466_p2 = pnand %p465_p1, %p459_p7 }
  0x23   : > { %469 = shalt.err (!%p466_p2)
}
  0x24   : > { %s470_s24 = scalar_lea.vmem %s665_s9, 128  ;;  %s569_s29 = smov [#allocation3]  }
  0x25   : > { %p471_p3 = scmp.ne.s32.totalorder %s665_s9, %s470_s24  ;;  %s475_s30 = sshll.u32 %s569_s29, 4  ;;  %s476_s30 = int_to_ptr.vmem [resolvable:$false] %s475_s30 }
  0x26   : > { %s477_s4 = scalar_lea.vmem %s476_s30, 256  ;;  %p478_p9 = scmp.lt.s32.totalorder %s665_s9, %s476_s30 }
  0x27   : > { %p473_p6 = pnand %p471_p3, %p457_p5  ;;  %p479_p4 = scmp.lt.s32.totalorder %s477_s4, %s470_s24 }
  0x29   : > { %p474_p11 = pneg %p473_p6  ;;  %p480_p10 = por %p479_p4, %p478_p9 }
  0x2b   : > { %p481_p12 = pnand %p480_p10, %p474_p11 }
  0x2d   : > { %484 = shalt.err (!%p481_p12)
}
  0x2e   : > { %400 = dma.hbm_to_vmem [thread:$0]  (!%p669_p0), %s663_s7, 128, %s665_s9, %s159_s11  }
  0x2f   : > { %p781_p1 = scmp.lt.s32.totalorder %s567_s19, 3  ;;  %p782_p2 = scmp.ge.s32.totalorder %s567_s19, 1 }
  0x31   : > { %p190_p5 = pnand %p782_p2, %p781_p1 }
  0x32   : > { %s705_s5 = sand.u32 (!%p190_p5), 1, %s551_s15  }
  0x33   : > { %193 = sbr.rel (%p190_p5) target bundleno = 88 (0x58), region = 32  ;;  %s383_s6 = sshll.u32 (!%p190_p5), %s705_s5, 3 }
  0x34   : > { %s196_s8 = scalar_lea.sflag (!%p190_p5), [#allocation4], %s705_s5  ;;  %s199_s12 = scalar_lea.vmem (!%p190_p5), [#allocation3], %s383_s6 }
  0x3a   : > { %538 = dma.done.wait (%p641_p8), %s196_s8, 128  }
  0x3b   : > { %540 = vsyncadd (%p641_p8), %s196_s8, 4294967168  ;;  %p232_p9 = scmp.lt.s32.totalorder %s559_s17, 1  ;;  %v247_v0 = vlaneseq  ;;  %s241_s7 = sld [smem:[#allocation2]]  ;;  %v242_v9 = vld [vmem:[%s199_s12] sm:$0xff] }
  0x3c   : > { %s229_s25 = scalar_lea.vmem [#allocation6], %s383_s6  ;;  %s392_s22 = sshll.u32 %s559_s17, 7 }
  0x3d   : > { %s233_s9 = scalar_select %p232_p9, %s559_s17, 1  ;;  %v248_v1 = vshrl.u32 %v247_v0, 7 }
  0x3e   : > { %s276_s20 = sshll.u32 %s229_s25, 4  ;;  %s724_s29 = scalar_lea.hbm %s774_s3, %s392_s22  ;;  %s719_s20 = int_to_ptr.vmem [resolvable:$true] %s276_s20 }
  0x3f   : > { %s385_s10 = sshll.u32 %s233_s9, 1  ;;  %v249_v2 = vsub.s32 0, %v248_v1  ;;  %v253_v3 = vsub.s32 1, %v248_v1  ;;  %s260_s30 = scalar_lea.sflag [#allocation5], %s705_s5 }
  0x40   : > { %s238_s0 = scalar_lea.vmem %s773_s2, %s385_s10  ;;  %s485_s4 = scalar_lea.vmem %s719_s20, 128 }
  0x41   : > { %v243_v4 = vld [vmem:[%s238_s0] sm:$0x3]  ;;  %v244_v5 = vstv %s241_s7  ;;  %p486_p8 = scmp.ne.s32.totalorder %s719_s20, %s485_s4  ;;  %p783_p11 = scmp.ne.s32.totalorder %s778_s26, 0 }
  0x42   : > { %v245_v6 = vmul.f32 %v244_v5, %v243_v4  ;;  %s570_s17 = smov [#allocation6]  }
  0x43   : > { %p487_p0 = pnand %p486_p8, %p783_p11  ;;  %s489_s6 = sshll.u32 %s570_s17, 4  ;;  %s490_s6 = int_to_ptr.vmem [resolvable:$false] %s489_s6 }
  0x44   : > { %v250_v7 = vrot.slane %v245_v6, %v249_v2  ;;  %v254_v8 = vrot.slane %v245_v6, %v253_v3  ;;  %s491_s8 = scalar_lea.vmem %s490_s6, 256  ;;  %p492_p13 = scmp.lt.s32.totalorder %s719_s20, %s490_s6 }
  0x45   : > { %p488_p7 = pneg %p487_p0  ;;  %p493_p3 = scmp.lt.s32.totalorder %s491_s8, %s485_s4 }
  0x46   : > { %v255_v10 = vcombine.low %v250_v7, %v254_v8 }
  0x47   : > { %p494_p6 = por %p493_p3, %p492_p13 }
  0x48   : > { %v257_v11 = vadd.f32 %v255_v10, %v242_v9 }
  0x49   : > { %p495_p4 = pnand %p494_p6, %p488_p7 }
  0x4a   : > { %258 = vst [vmem:[%s229_s25] sm:$0xff] %v257_v11 }
  0x4b   : > { %498 = shalt.err (!%p495_p4)
}
  0x4c   : > { %s499_s5 = scalar_lea.hbm %s724_s29, 128  ;;  %s503_s9 = scalar_lea.hbm %s774_s3, 256 }
  0x4d   : > { %p500_p10 = scmp.ne.s32.totalorder %s724_s29, %s499_s5  ;;  %p504_p2 = scmp.lt.u32.totalorder %s724_s29, %s774_s3 }
  0x4e   : > { %p505_p5 = scmp.lt.u32.totalorder %s503_s9, %s499_s5  ;;  %p507_p8 = scmp.lt.u32.totalorder %s499_s5, %s724_s29 }
  0x4f   : > { %p501_p12 = pnand %p500_p10, %p783_p11 }
  0x50   : > { %p506_p9 = por %p505_p5, %p504_p2 }
  0x51   : > { %p502_p1 = pneg %p501_p12 }
  0x52   : > { %p508_p0 = por %p507_p8, %p506_p9 }
  0x54   : > { %p509_p7 = pnand %p508_p0, %p502_p1 }
  0x56   : > { %512 = shalt.err (!%p509_p7)
}
  0x57   : > { %395 = dma.vmem_to_hbm [thread:$0]  (%p783_p11), %s719_s20, 128, %s724_s29, %s260_s30  }
  0x58 PF: > { %s288_s13 = sand.u32 1, %s547_s14   ;;  %p784_p13 = scmp.ne.s32.totalorder %s779_s28, 0 }
  0x59   : > { %p785_p3 = scmp.ge.s32.totalorder %s567_s19, 2  ;;  %s289_s0 = scalar_lea.sflag [#allocation5], %s288_s13 }
  0x5b   : > { %p402_p6 = pnand %p785_p3, %p784_p13 }
  0x5d   : > { %542 = dma.done.wait (!%p402_p6), %s289_s0, 128  }
  0x5e   : > { %544 = vsyncadd (!%p402_p6), %s289_s0, 4294967168  ;;  %s20_s19 = sadd.s32 1, %s567_s19   ;;  %s786_s14 = smov %s551_s15 }
  0x5f   : > { %p17_p4 = scmp.ge.s32.totalorder %s20_s19, 4   ;;  %s787_s15 = smov %s555_s16 }
  0x60   : > { %s788_s16 = smov %s650_s27  ;;  %s789_s17 = smov %s563_s18 }
  0x61   : > { %s790_s18 = smov %s792_s21  ;;  %19 = sbr.rel (!%p17_p4) target bundleno = 8 (0x8), region = 80 }
  0x68   :  { %294 = vsyncpa [#allocation4], 1 }
  0x69   :  { %296 = vsyncpa [#allocation4 + $0x1], 1 }
  0x6a   :  { %297 = vsyncpa [#allocation5], 1 }
  0x6b   :  { %299 = vsyncpa [#allocation5 + $0x1], 1 }

</bundles_post_ra>
